<compile_context>
chip_gen: v5e
topology: v5e:2x2
jax: 0.10.0
libtpu: 0.0.40
codegen_flags: <defaults>
</compile_context>

<pallas_src>
import functools
import math

import jax
import jax.numpy as jnp
from jax import lax
from jax.experimental import pallas as pl
from jax.experimental.pallas import tpu as pltpu

_LANE = 128
_SUBLANE = 8


def _round_up(v, m):
    return ((v + m - 1) // m) * m


def _softplus(x):
    # numerically-stable softplus; same formula in kernel and reference
    return jnp.maximum(x, 0.0) + jnp.log(1.0 + jnp.exp(-jnp.abs(x)))


def _stss_kernel(L, D, x_ref, pos_ref, dmask_ref, gamma_ref, beta_ref, w_ref,
                 b_ref, cw0_ref, cw1_ref, cw2_ref, cb_ref, ts_ref, out_ref):
    """One grid step = `rows = bb * L` flattened rows (bb whole sequences)."""
    x = x_ref[...].astype(jnp.float32)            # (rows, Dp); padded lanes are 0
    rows, Dp = x.shape
    pos = pos_ref[...]                            # (rows, 1) position inside its sequence

    # ---- LayerNorm over the true d_model (= D); padded lanes masked out ----
    inv_d = 1.0 / D
    mean = jnp.sum(x, axis=-1, keepdims=True) * inv_d          # pad lanes of x are zero
    centered = (x - mean) * dmask_ref[...]                     # zero the padded lanes
    var = jnp.sum(centered * centered, axis=-1, keepdims=True) * inv_d
    xn = centered * lax.rsqrt(var + 1e-5) * gamma_ref[...] + beta_ref[...]

    # ---- projection D -> 3D on the MXU (operands in w_ref.dtype, f32 accumulate) ----
    proj = jnp.dot(xn.astype(w_ref.dtype), w_ref[...],
                   preferred_element_type=jnp.float32) + b_ref[...]
    delta = _softplus(proj[:, :Dp])               # lane-aligned slices (Dp % 128 == 0)
    Bm = proj[:, Dp:2 * Dp]
    Cm = proj[:, 2 * Dp:]

    # ---- depthwise temporal conv (k=3, pad=1, groups=D): sublane rolls + masks ----
    # shift rows-1 == -1 (mod rows); Mosaic's rotate takes a shift in [0, rows).
    x_prev = jnp.where(pos >= 1, pltpu.roll(xn, 1, axis=0), 0.0)        # x[t-1]
    x_next = jnp.where(pos < L - 1, pltpu.roll(xn, rows - 1, axis=0), 0.0)  # x[t+1]
    gate = (x_prev * cw0_ref[...] + xn * cw1_ref[...] + x_next * cw2_ref[...]
            + cb_ref[...])
    gate = 1.0 / (1.0 + jnp.exp(-gate))           # exact sigmoid (approx recip was 1e-2 off)

    # ---- selective gating + state-space coefficients ----
    exp_ts = jnp.exp(ts_ref[...])                 # (1, Dp), hoisted, once per tile
    A = jnp.exp(-(delta * gate) * exp_ts)         # per-(t, d) decay in (0, 1]
    bt = (Bm * gate) * xn                         # per-(t, d) input term
    Cg = Cm * gate                                # per-(t, d) output term

    # ---- h_t = A_t*h_{t-1} + bt_t (h_{-1}=0): Hillis-Steele associative scan,
    #      ceil(log2(L)) vectorized passes; the `pos >= d` mask substitutes the
    #      identity (1, 0) so sequences inside the block never mix. ----
    # TODO(synk): for L >= 512 switch to a two-level (intra-8-row + carry) scan if
    # the XLU/VALU slots saturate; single-level is fine at short/medium L.
    d = 1
    while d < L:
        live = pos >= d                            # (rows, 1), broadcast along lanes
        bt = A * jnp.where(live, pltpu.roll(bt, d, axis=0), 0.0) + bt
        if 2 * d < L:                              # A is dead after the last pass
            A = A * jnp.where(live, pltpu.roll(A, d, axis=0), 1.0)
        d *= 2
    # bt now holds h_t for every row.

    # residual + y; single dense lane-aligned store.  Dropout = identity (eval).
    out_ref[...] = (x + Cg * bt).astype(out_ref.dtype)


def _tpu_vmem_capacity_bytes():
    """Physical VMEM per TensorCore (best-effort query; never affects numerics)."""
    try:
        cap = getattr(pltpu.get_tpu_info(), "vmem_capacity_bytes", None)
        if cap:
            return int(cap)
    except Exception:
        pass
    return 64 << 20          # conservative (v7x-sized) fallback


def _plan_tiles(B, L, Dp, x_bytes, w_bytes, out_bytes):
    """Pick sequences-per-step (bb), padded batch, and an explicit VMEM limit."""
    vmem_cap = _tpu_vmem_capacity_bytes()
    # v5e/v6e: 128 MiB physical (default scoped limit is only 16/32 MiB -> raise it
    # and take big row tiles).  v7x: 64 MiB per TC -> smaller budget and prefer
    # >= 2 grid steps so ("parallel",) can shard work across both TensorCores.
    small_vmem = vmem_cap <= (96 << 20)
    vmem_limit = int(min((vmem_cap * 3) // 4, 96 << 20))     # ~48 MiB v7x, ~96 MiB v5e/v6e
    target_rows = 512 if small_vmem else 2048
    budget = int(0.8 * vmem_limit)

    def working_set(rows):
        io = 2 * rows * Dp * (x_bytes + out_bytes)        # double-buffered x / out tiles
        temps = 18 * rows * Dp * 4                        # live f32 temps incl. (rows, 3Dp) proj
        weight = 2 * Dp * (3 * Dp) * w_bytes              # double-buffered projection weight
        small = 2 * (12 * Dp + rows) * 4                  # small params + pos column
        return io + temps + weight + small

    m = _SUBLANE // math.gcd(L, _SUBLANE)                 # bb multiple -> rows % 8 == 0
    bb_cap = _round_up(B, m)                              # never fold more than (padded) batch
    bb = max(m, min(bb_cap, (target_rows // (L * m)) * m))
    while bb > m and working_set(bb * L) > budget:
        bb -= m
    if small_vmem and B >= 2:                             # keep >= 2 grid steps for 2 TCs
        two_step_cap = ((B - 1) // m) * m
        if two_step_cap >= m:
            bb = min(bb, two_step_cap)
    b_pad = _round_up(B, bb)
    return bb, b_pad, vmem_limit


def stss_forward(x, gamma, beta, W, b, cw, cb, ts, *, mxu_dtype=jnp.bfloat16):
    """SelectiveTemporalStateSpace forward (eval mode).

    x: (B, L, D).  gamma/beta/cb/ts: (D,) or (1, D).  W: (D, 3D) (x @ W layout,
    i.e. the torch Linear weight transposed).  b: (3D,).  cw: (3, D) depthwise
    conv taps applied to [x[t-1], x[t], x[t+1]].
    """
    B, L, D = x.shape
    f32 = jnp.float32
    Dp = _round_up(D, _LANE)
    bb, b_pad, vmem_limit = _plan_tiles(
        B, L, Dp, jnp.dtype(x.dtype).itemsize, jnp.dtype(mxu_dtype).itemsize,
        jnp.dtype(x.dtype).itemsize)
    rows = bb * L

    def pad_vec(a):                                   # (..., D) -> (1, Dp), zero-padded lanes
        return jnp.pad(a.reshape(1, D).astype(f32), ((0, 0), (0, Dp - D)))

    # activation stream keeps the caller's dtype (bf16 in/out supported)
    x2d = jnp.pad(x.reshape(B * L, D), ((0, (b_pad - B) * L), (0, Dp - D)))
    pos = (jnp.arange(rows, dtype=jnp.int32) % L).reshape(rows, 1)
    dmask = pad_vec(jnp.ones((D,), f32))              # 1 on real lanes, 0 on padding

    # projection weight/bias: keep the 3 output segments lane-aligned at multiples of Dp
    W_f = W.astype(f32)
    b_f = b.reshape(-1).astype(f32)
    W_pad = jnp.zeros((Dp, 3 * Dp), f32)
    b_pad_v = jnp.zeros((1, 3 * Dp), f32)
    for s in range(3):
        W_pad = W_pad.at[:D, s * Dp:s * Dp + D].set(W_f[:, s * D:(s + 1) * D])
        b_pad_v = b_pad_v.at[0, s * Dp:s * Dp + D].set(b_f[s * D:(s + 1) * D])
    W_pad = W_pad.astype(mxu_dtype)                   # bf16: native MXU + half the VMEM

    cw_f = cw.astype(f32)
    const = lambda shape: pl.BlockSpec(shape, lambda i: (0,) * len(shape))

    out2d = pl.pallas_call(
        functools.partial(_stss_kernel, L, D),
        out_shape=jax.ShapeDtypeStruct((b_pad * L, Dp), x.dtype),
        grid_spec=pltpu.PrefetchScalarGridSpec(
            num_scalar_prefetch=0,
            grid=(b_pad // bb,),
            in_specs=[
                pl.BlockSpec((rows, Dp), lambda i: (i, 0)),   # x, flattened rows
                const((rows, 1)),                             # position within sequence
                const((1, Dp)),                               # lane mask (true d_model)
                const((1, Dp)),                               # LayerNorm gamma
                const((1, Dp)),                               # LayerNorm beta
                const((Dp, 3 * Dp)),                          # projection weight (bf16)
                const((1, 3 * Dp)),                           # projection bias
                const((1, Dp)),                               # conv tap k=0 (x[t-1])
                const((1, Dp)),                               # conv tap k=1 (x[t])
                const((1, Dp)),                               # conv tap k=2 (x[t+1])
                const((1, Dp)),                               # conv bias
                const((1, Dp)),                               # time_scale
            ],
            out_specs=pl.BlockSpec((rows, Dp), lambda i: (i, 0)),
        ),
        compiler_params=pltpu.CompilerParams(
            dimension_semantics=("parallel",),        # steps are independent sequences
            vmem_limit_bytes=vmem_limit),
    )(x2d, pos, dmask, pad_vec(gamma), pad_vec(beta), W_pad, b_pad_v,
      pad_vec(cw_f[0]), pad_vec(cw_f[1]), pad_vec(cw_f[2]), pad_vec(cb),
      pad_vec(ts))
    return out2d[:B * L, :D].reshape(B, L, D)


def stss_reference(x, gamma, beta, W, b, cw, cb, ts, mxu_dtype=jnp.float32):
    """Pure-JAX reference mirroring the PyTorch forward (eval mode).

    mxu_dtype=bfloat16 reproduces the kernel's bf16-operand / f32-accumulate
    projection so the two can be compared tightly.
    """
    B, L, D = x.shape
    xf = x.astype(jnp.float32)
    g, be = gamma.reshape(1, 1, D), beta.reshape(1, 1, D)
    mean = xf.mean(-1, keepdims=True)
    var = ((xf - mean) ** 2).mean(-1, keepdims=True)
    xn = (xf - mean) * lax.rsqrt(var + 1e-5) * g + be
    proj = jnp.dot(xn.astype(mxu_dtype), W.astype(mxu_dtype),
                   preferred_element_type=jnp.float32) + b.reshape(1, 1, 3 * D)
    delta = _softplus(proj[..., :D])
    Bm, Cm = proj[..., D:2 * D], proj[..., 2 * D:]
    xp = jnp.pad(xn, ((0, 0), (1, 1), (0, 0)))
    gate = (xp[:, :-2] * cw[0] + xp[:, 1:-1] * cw[1] + xp[:, 2:] * cw[2]
            + cb.reshape(1, 1, D))
    gate = 1.0 / (1.0 + jnp.exp(-gate))
    A = jnp.exp(-(delta * gate) * jnp.exp(ts.reshape(1, 1, D)))
    Bg, Cg = Bm * gate, Cm * gate
    h = jnp.zeros((B, D), jnp.float32)
    ys = []
    for t in range(L):
        h = A[:, t] * h + Bg[:, t] * xn[:, t]
        ys.append(Cg[:, t] * h)
    return xf + jnp.stack(ys, axis=1)


if __name__ == "__main__":
    B, L, D = 2, 8, 32   # batch, seq_len, d_model (temporal_window = 3)

    key = jax.random.PRNGKey(0)
    ks = jax.random.split(key, 8)
    x = jax.random.normal(ks[0], (B, L, D), jnp.float32)
    gamma = 1.0 + 0.1 * jax.random.normal(ks[1], (D,), jnp.float32)   # LayerNorm weight
    beta = 0.1 * jax.random.normal(ks[2], (D,), jnp.float32)          # LayerNorm bias
    W = jax.random.normal(ks[3], (D, 3 * D), jnp.float32) / jnp.sqrt(D)  # Linear weight (x @ W layout)
    b = 0.1 * jax.random.normal(ks[4], (3 * D,), jnp.float32)         # Linear bias
    cw = jax.random.normal(ks[5], (3, D), jnp.float32) / jnp.sqrt(3.0)   # depthwise conv weight (K, D)
    cb = 0.1 * jax.random.normal(ks[6], (D,), jnp.float32)            # conv bias
    ts = jax.random.normal(ks[7], (D,), jnp.float32)                  # time_scale parameter

    out = stss_forward(x, gamma, beta, W, b, cw, cb, ts)              # bf16-MXU default
    out = jax.block_until_ready(out)
    assert out.shape == (B, L, D) and out.dtype == x.dtype

    # Tight structural check: reference with the same bf16-operand / f32-accumulate
    # projection as the kernel; everything else is exact f32 on both sides.
    ref_bf16 = stss_reference(x, gamma, beta, W, b, cw, cb, ts, mxu_dtype=jnp.bfloat16)
    err_bf16 = float(jnp.max(jnp.abs(out - ref_bf16)))
    assert jnp.allclose(out, ref_bf16, rtol=2e-2, atol=2e-2), err_bf16

    # Sanity bound vs. the full-f32 reference (= PyTorch module numerics); the gap is
    # dominated by the bf16 MXU operands requested by the performance review.
    ref_f32 = stss_reference(x, gamma, beta, W, b, cw, cb, ts, mxu_dtype=jnp.float32)
    err_f32 = float(jnp.max(jnp.abs(out - ref_f32)))
    assert err_f32 < 0.2, err_f32

    print("KERNEL_OK")
</pallas_src>

<mosaic_0001>
module attributes {stable_mosaic.version = 11 : i64} {
  func.func @_stss_kernel(%arg0: i32, %arg1: memref<8x128xf32, #tpu.memory_space<vmem>>, %arg2: memref<8x1xi32, #tpu.memory_space<vmem>>, %arg3: memref<1x128xf32, #tpu.memory_space<vmem>>, %arg4: memref<1x128xf32, #tpu.memory_space<vmem>>, %arg5: memref<1x128xf32, #tpu.memory_space<vmem>>, %arg6: memref<128x384xbf16, #tpu.memory_space<vmem>>, %arg7: memref<1x384xf32, #tpu.memory_space<vmem>>, %arg8: memref<1x128xf32, #tpu.memory_space<vmem>>, %arg9: memref<1x128xf32, #tpu.memory_space<vmem>>, %arg10: memref<1x128xf32, #tpu.memory_space<vmem>>, %arg11: memref<1x128xf32, #tpu.memory_space<vmem>>, %arg12: memref<1x128xf32, #tpu.memory_space<vmem>>, %arg13: memref<8x128xf32, #tpu.memory_space<vmem>>) attributes {dimension_semantics = [#tpu.dimension_semantics<parallel>], iteration_bounds = array<i64: 2>, scalar_prefetch = 0 : i64, scratch_operands = 0 : i64, tpu.core_type = #tpu.core_type<tc>, window_params = [{transform_indices = @transform_0, window_bounds = array<i64: 8, 128>}, {pipeline_mode = #tpu.pipeline_mode<synchronous>, transform_indices = @transform_1, window_bounds = array<i64: 8, 1>}, {pipeline_mode = #tpu.pipeline_mode<synchronous>, transform_indices = @transform_2, window_bounds = array<i64: 1, 128>}, {pipeline_mode = #tpu.pipeline_mode<synchronous>, transform_indices = @transform_3, window_bounds = array<i64: 1, 128>}, {pipeline_mode = #tpu.pipeline_mode<synchronous>, transform_indices = @transform_4, window_bounds = array<i64: 1, 128>}, {pipeline_mode = #tpu.pipeline_mode<synchronous>, transform_indices = @transform_5, window_bounds = array<i64: 128, 384>}, {pipeline_mode = #tpu.pipeline_mode<synchronous>, transform_indices = @transform_6, window_bounds = array<i64: 1, 384>}, {pipeline_mode = #tpu.pipeline_mode<synchronous>, transform_indices = @transform_7, window_bounds = array<i64: 1, 128>}, {pipeline_mode = #tpu.pipeline_mode<synchronous>, transform_indices = @transform_8, window_bounds = array<i64: 1, 128>}, {pipeline_mode = #tpu.pipeline_mode<synchronous>, transform_indices = @transform_9, window_bounds = array<i64: 1, 128>}, {pipeline_mode = #tpu.pipeline_mode<synchronous>, transform_indices = @transform_10, window_bounds = array<i64: 1, 128>}, {pipeline_mode = #tpu.pipeline_mode<synchronous>, transform_indices = @transform_11, window_bounds = array<i64: 1, 128>}, {transform_indices = @transform_12, window_bounds = array<i64: 8, 128>}]} {
    %c0 = arith.constant 0 : index
    %c0_0 = arith.constant 0 : index
    %0 = vector.load %arg1[%c0, %c0_0] : memref<8x128xf32, #tpu.memory_space<vmem>>, vector<8x128xf32>
    %c0_1 = arith.constant 0 : index
    %c0_2 = arith.constant 0 : index
    %1 = vector.load %arg2[%c0_1, %c0_2] : memref<8x1xi32, #tpu.memory_space<vmem>>, vector<8x1xi32>
    %cst = arith.constant dense<0.000000e+00> : vector<8xf32>
    %2 = vector.multi_reduction <add>, %0, %cst [1] : vector<8x128xf32> to vector<8xf32>
    %3 = vector.shape_cast %2 : vector<8xf32> to vector<8x1xf32>
    %cst_3 = arith.constant 3.125000e-02 : f32
    %4 = vector.broadcast %cst_3 : f32 to vector<8x1xf32>
    %5 = arith.mulf %3, %4 : vector<8x1xf32>
    %6 = vector.broadcast %5 : vector<8x1xf32> to vector<8x128xf32>
    %7 = arith.subf %0, %6 : vector<8x128xf32>
    %c0_4 = arith.constant 0 : index
    %c0_5 = arith.constant 0 : index
    %8 = vector.load %arg3[%c0_4, %c0_5] : memref<1x128xf32, #tpu.memory_space<vmem>>, vector<1x128xf32>
    %9 = vector.broadcast %8 : vector<1x128xf32> to vector<8x128xf32>
    %10 = arith.mulf %7, %9 : vector<8x128xf32>
    %11 = arith.mulf %10, %10 : vector<8x128xf32>
    %cst_6 = arith.constant dense<0.000000e+00> : vector<8xf32>
    %12 = vector.multi_reduction <add>, %11, %cst_6 [1] : vector<8x128xf32> to vector<8xf32>
    %13 = vector.shape_cast %12 : vector<8xf32> to vector<8x1xf32>
    %cst_7 = arith.constant 3.125000e-02 : f32
    %14 = vector.broadcast %cst_7 : f32 to vector<8x1xf32>
    %15 = arith.mulf %13, %14 : vector<8x1xf32>
    %cst_8 = arith.constant 9.99999974E-6 : f32
    %16 = vector.broadcast %cst_8 : f32 to vector<8x1xf32>
    %17 = arith.addf %15, %16 : vector<8x1xf32>
    %18 = math.rsqrt %17 : vector<8x1xf32>
    %19 = vector.broadcast %18 : vector<8x1xf32> to vector<8x128xf32>
    %20 = arith.mulf %10, %19 : vector<8x128xf32>
    %c0_9 = arith.constant 0 : index
    %c0_10 = arith.constant 0 : index
    %21 = vector.load %arg4[%c0_9, %c0_10] : memref<1x128xf32, #tpu.memory_space<vmem>>, vector<1x128xf32>
    %22 = vector.broadcast %21 : vector<1x128xf32> to vector<8x128xf32>
    %23 = arith.mulf %20, %22 : vector<8x128xf32>
    %c0_11 = arith.constant 0 : index
    %c0_12 = arith.constant 0 : index
    %24 = vector.load %arg5[%c0_11, %c0_12] : memref<1x128xf32, #tpu.memory_space<vmem>>, vector<1x128xf32>
    %25 = vector.broadcast %24 : vector<1x128xf32> to vector<8x128xf32>
    %26 = arith.addf %23, %25 : vector<8x128xf32>
    %27 = arith.truncf %26 : vector<8x128xf32> to vector<8x128xbf16>
    %c0_13 = arith.constant 0 : index
    %c0_14 = arith.constant 0 : index
    %28 = vector.load %arg6[%c0_13, %c0_14] : memref<128x384xbf16, #tpu.memory_space<vmem>>, vector<128x384xbf16>
    %cst_15 = arith.constant dense<0.000000e+00> : vector<8x384xf32>
    %29 = tpu.matmul %27, %28, %cst_15 {dimension_numbers = #tpu.dot_dimension_numbers<[1], [0], [0], [1], [0, 0, 1, 1], [], []>} : vector<8x128xbf16>, vector<128x384xbf16>, vector<8x384xf32> -> vector<8x384xf32>
    %c0_16 = arith.constant 0 : index
    %c0_17 = arith.constant 0 : index
    %30 = vector.load %arg7[%c0_16, %c0_17] : memref<1x384xf32, #tpu.memory_space<vmem>>, vector<1x384xf32>
    %31 = vector.broadcast %30 : vector<1x384xf32> to vector<8x384xf32>
    %32 = arith.addf %29, %31 : vector<8x384xf32>
    %33 = vector.extract_strided_slice %32 {offsets = [0, 0], sizes = [8, 128], strides = [1, 1]} : vector<8x384xf32> to vector<8x128xf32>
    %cst_18 = arith.constant 0.000000e+00 : f32
    %34 = vector.broadcast %cst_18 : f32 to vector<8x128xf32>
    %35 = arith.maximumf %33, %34 : vector<8x128xf32>
    %36 = math.absf %33 : vector<8x128xf32>
    %cst_19 = arith.constant 0.000000e+00 : f32
    %37 = vector.broadcast %cst_19 : f32 to vector<8x128xf32>
    %38 = arith.subf %37, %36 : vector<8x128xf32>
    %39 = math.exp %38 : vector<8x128xf32>
    %cst_20 = arith.constant 1.000000e+00 : f32
    %40 = vector.broadcast %cst_20 : f32 to vector<8x128xf32>
    %41 = arith.addf %40, %39 : vector<8x128xf32>
    %42 = math.log %41 : vector<8x128xf32>
    %43 = arith.addf %35, %42 : vector<8x128xf32>
    %44 = vector.extract_strided_slice %32 {offsets = [0, 128], sizes = [8, 128], strides = [1, 1]} : vector<8x384xf32> to vector<8x128xf32>
    %45 = vector.extract_strided_slice %32 {offsets = [0, 256], sizes = [8, 128], strides = [1, 1]} : vector<8x384xf32> to vector<8x128xf32>
    %c1_i32 = arith.constant 1 : i32
    %46 = vector.broadcast %c1_i32 : i32 to vector<8x1xi32>
    %47 = arith.cmpi sge, %1, %46 : vector<8x1xi32>
    %c1_i32_21 = arith.constant 1 : i32
    %48 = tpu.dynamic_rotate %26 by %c1_i32_21 dim 0 : vector<8x128xf32>, i32 -> vector<8x128xf32>
    %cst_22 = arith.constant 0.000000e+00 : f32
    %49 = vector.shape_cast %47 : vector<8x1xi1> to vector<8x1xi1>
    %50 = vector.broadcast %49 : vector<8x1xi1> to vector<8x128xi1>
    %51 = vector.broadcast %cst_22 : f32 to vector<8x128xf32>
    %52 = arith.select %50, %48, %51 : vector<8x128xi1>, vector<8x128xf32>
    %c7_i32 = arith.constant 7 : i32
    %53 = vector.broadcast %c7_i32 : i32 to vector<8x1xi32>
    %54 = arith.cmpi slt, %1, %53 : vector<8x1xi32>
    %c7_i32_23 = arith.constant 7 : i32
    %55 = tpu.dynamic_rotate %26 by %c7_i32_23 dim 0 : vector<8x128xf32>, i32 -> vector<8x128xf32>
    %cst_24 = arith.constant 0.000000e+00 : f32
    %56 = vector.shape_cast %54 : vector<8x1xi1> to vector<8x1xi1>
    %57 = vector.broadcast %56 : vector<8x1xi1> to vector<8x128xi1>
    %58 = vector.broadcast %cst_24 : f32 to vector<8x128xf32>
    %59 = arith.select %57, %55, %58 : vector<8x128xi1>, vector<8x128xf32>
    %c0_25 = arith.constant 0 : index
    %c0_26 = arith.constant 0 : index
    %60 = vector.load %arg8[%c0_25, %c0_26] : memref<1x128xf32, #tpu.memory_space<vmem>>, vector<1x128xf32>
    %61 = vector.broadcast %60 : vector<1x128xf32> to vector<8x128xf32>
    %62 = arith.mulf %52, %61 : vector<8x128xf32>
    %c0_27 = arith.constant 0 : index
    %c0_28 = arith.constant 0 : index
    %63 = vector.load %arg9[%c0_27, %c0_28] : memref<1x128xf32, #tpu.memory_space<vmem>>, vector<1x128xf32>
    %64 = vector.broadcast %63 : vector<1x128xf32> to vector<8x128xf32>
    %65 = arith.mulf %26, %64 : vector<8x128xf32>
    %66 = arith.addf %62, %65 : vector<8x128xf32>
    %c0_29 = arith.constant 0 : index
    %c0_30 = arith.constant 0 : index
    %67 = vector.load %arg10[%c0_29, %c0_30] : memref<1x128xf32, #tpu.memory_space<vmem>>, vector<1x128xf32>
    %68 = vector.broadcast %67 : vector<1x128xf32> to vector<8x128xf32>
    %69 = arith.mulf %59, %68 : vector<8x128xf32>
    %70 = arith.addf %66, %69 : vector<8x128xf32>
    %c0_31 = arith.constant 0 : index
    %c0_32 = arith.constant 0 : index
    %71 = vector.load %arg11[%c0_31, %c0_32] : memref<1x128xf32, #tpu.memory_space<vmem>>, vector<1x128xf32>
    %72 = vector.broadcast %71 : vector<1x128xf32> to vector<8x128xf32>
    %73 = arith.addf %70, %72 : vector<8x128xf32>
    %cst_33 = arith.constant 0.000000e+00 : f32
    %74 = vector.broadcast %cst_33 : f32 to vector<8x128xf32>
    %75 = arith.subf %74, %73 : vector<8x128xf32>
    %76 = math.exp %75 : vector<8x128xf32>
    %cst_34 = arith.constant 1.000000e+00 : f32
    %77 = vector.broadcast %cst_34 : f32 to vector<8x128xf32>
    %78 = arith.addf %77, %76 : vector<8x128xf32>
    %cst_35 = arith.constant 1.000000e+00 : f32
    %79 = vector.broadcast %cst_35 : f32 to vector<8x128xf32>
    %80 = arith.divf %79, %78 : vector<8x128xf32>
    %c0_36 = arith.constant 0 : index
    %c0_37 = arith.constant 0 : index
    %81 = vector.load %arg12[%c0_36, %c0_37] : memref<1x128xf32, #tpu.memory_space<vmem>>, vector<1x128xf32>
    %82 = math.exp %81 : vector<1x128xf32>
    %83 = arith.mulf %43, %80 : vector<8x128xf32>
    %cst_38 = arith.constant 0.000000e+00 : f32
    %84 = vector.broadcast %cst_38 : f32 to vector<8x128xf32>
    %85 = arith.subf %84, %83 : vector<8x128xf32>
    %86 = vector.broadcast %82 : vector<1x128xf32> to vector<8x128xf32>
    %87 = arith.mulf %85, %86 : vector<8x128xf32>
    %88 = math.exp %87 : vector<8x128xf32>
    %89 = arith.mulf %44, %80 : vector<8x128xf32>
    %90 = arith.mulf %89, %26 : vector<8x128xf32>
    %91 = arith.mulf %45, %80 : vector<8x128xf32>
    %c1_i32_39 = arith.constant 1 : i32
    %92 = vector.broadcast %c1_i32_39 : i32 to vector<8x1xi32>
    %93 = arith.cmpi sge, %1, %92 : vector<8x1xi32>
    %c1_i32_40 = arith.constant 1 : i32
    %94 = tpu.dynamic_rotate %90 by %c1_i32_40 dim 0 : vector<8x128xf32>, i32 -> vector<8x128xf32>
    %cst_41 = arith.constant 0.000000e+00 : f32
    %95 = vector.shape_cast %93 : vector<8x1xi1> to vector<8x1xi1>
    %96 = vector.broadcast %95 : vector<8x1xi1> to vector<8x128xi1>
    %97 = vector.broadcast %cst_41 : f32 to vector<8x128xf32>
    %98 = arith.select %96, %94, %97 : vector<8x128xi1>, vector<8x128xf32>
    %99 = arith.mulf %88, %98 : vector<8x128xf32>
    %100 = arith.addf %99, %90 : vector<8x128xf32>
    %c1_i32_42 = arith.constant 1 : i32
    %101 = tpu.dynamic_rotate %88 by %c1_i32_42 dim 0 : vector<8x128xf32>, i32 -> vector<8x128xf32>
    %cst_43 = arith.constant 1.000000e+00 : f32
    %102 = vector.shape_cast %93 : vector<8x1xi1> to vector<8x1xi1>
    %103 = vector.broadcast %102 : vector<8x1xi1> to vector<8x128xi1>
    %104 = vector.broadcast %cst_43 : f32 to vector<8x128xf32>
    %105 = arith.select %103, %101, %104 : vector<8x128xi1>, vector<8x128xf32>
    %106 = arith.mulf %88, %105 : vector<8x128xf32>
    %c2_i32 = arith.constant 2 : i32
    %107 = vector.broadcast %c2_i32 : i32 to vector<8x1xi32>
    %108 = arith.cmpi sge, %1, %107 : vector<8x1xi32>
    %c2_i32_44 = arith.constant 2 : i32
    %109 = tpu.dynamic_rotate %100 by %c2_i32_44 dim 0 : vector<8x128xf32>, i32 -> vector<8x128xf32>
    %cst_45 = arith.constant 0.000000e+00 : f32
    %110 = vector.shape_cast %108 : vector<8x1xi1> to vector<8x1xi1>
    %111 = vector.broadcast %110 : vector<8x1xi1> to vector<8x128xi1>
    %112 = vector.broadcast %cst_45 : f32 to vector<8x128xf32>
    %113 = arith.select %111, %109, %112 : vector<8x128xi1>, vector<8x128xf32>
    %114 = arith.mulf %106, %113 : vector<8x128xf32>
    %115 = arith.addf %114, %100 : vector<8x128xf32>
    %c2_i32_46 = arith.constant 2 : i32
    %116 = tpu.dynamic_rotate %106 by %c2_i32_46 dim 0 : vector<8x128xf32>, i32 -> vector<8x128xf32>
    %cst_47 = arith.constant 1.000000e+00 : f32
    %117 = vector.shape_cast %108 : vector<8x1xi1> to vector<8x1xi1>
    %118 = vector.broadcast %117 : vector<8x1xi1> to vector<8x128xi1>
    %119 = vector.broadcast %cst_47 : f32 to vector<8x128xf32>
    %120 = arith.select %118, %116, %119 : vector<8x128xi1>, vector<8x128xf32>
    %121 = arith.mulf %106, %120 : vector<8x128xf32>
    %c4_i32 = arith.constant 4 : i32
    %122 = vector.broadcast %c4_i32 : i32 to vector<8x1xi32>
    %123 = arith.cmpi sge, %1, %122 : vector<8x1xi32>
    %c4_i32_48 = arith.constant 4 : i32
    %124 = tpu.dynamic_rotate %115 by %c4_i32_48 dim 0 : vector<8x128xf32>, i32 -> vector<8x128xf32>
    %cst_49 = arith.constant 0.000000e+00 : f32
    %125 = vector.shape_cast %123 : vector<8x1xi1> to vector<8x1xi1>
    %126 = vector.broadcast %125 : vector<8x1xi1> to vector<8x128xi1>
    %127 = vector.broadcast %cst_49 : f32 to vector<8x128xf32>
    %128 = arith.select %126, %124, %127 : vector<8x128xi1>, vector<8x128xf32>
    %129 = arith.mulf %121, %128 : vector<8x128xf32>
    %130 = arith.addf %129, %115 : vector<8x128xf32>
    %131 = arith.mulf %91, %130 : vector<8x128xf32>
    %132 = arith.addf %0, %131 : vector<8x128xf32>
    %c0_50 = arith.constant 0 : index
    %c0_51 = arith.constant 0 : index
    %133 = vector.load %arg13[%c0_50, %c0_51] : memref<8x128xf32, #tpu.memory_space<vmem>>, vector<8x128xf32>
    tpu.vector_store %arg13[%c0_50, %c0_51], %132 {strides = array<i32>} : memref<8x128xf32, #tpu.memory_space<vmem>>, vector<8x128xf32>,
    return
  }
  func.func @transform_0(%arg0: i32) -> (i32, i32) {
    %c0_i32 = arith.constant 0 : i32
    %c0_i32_0 = arith.constant 0 : i32
    return %arg0, %c0_i32 : i32, i32
  }
  func.func @transform_1(%arg0: i32) -> (i32, i32) {
    %c0_i32 = arith.constant 0 : i32
    %c0_i32_0 = arith.constant 0 : i32
    %c0_i32_1 = arith.constant 0 : i32
    return %c0_i32, %c0_i32_0 : i32, i32
  }
  func.func @transform_2(%arg0: i32) -> (i32, i32) {
    %c0_i32 = arith.constant 0 : i32
    %c0_i32_0 = arith.constant 0 : i32
    %c0_i32_1 = arith.constant 0 : i32
    return %c0_i32, %c0_i32_0 : i32, i32
  }
  func.func @transform_3(%arg0: i32) -> (i32, i32) {
    %c0_i32 = arith.constant 0 : i32
    %c0_i32_0 = arith.constant 0 : i32
    %c0_i32_1 = arith.constant 0 : i32
    return %c0_i32, %c0_i32_0 : i32, i32
  }
  func.func @transform_4(%arg0: i32) -> (i32, i32) {
    %c0_i32 = arith.constant 0 : i32
    %c0_i32_0 = arith.constant 0 : i32
    %c0_i32_1 = arith.constant 0 : i32
    return %c0_i32, %c0_i32_0 : i32, i32
  }
  func.func @transform_5(%arg0: i32) -> (i32, i32) {
    %c0_i32 = arith.constant 0 : i32
    %c0_i32_0 = arith.constant 0 : i32
    %c0_i32_1 = arith.constant 0 : i32
    return %c0_i32, %c0_i32_0 : i32, i32
  }
  func.func @transform_6(%arg0: i32) -> (i32, i32) {
    %c0_i32 = arith.constant 0 : i32
    %c0_i32_0 = arith.constant 0 : i32
    %c0_i32_1 = arith.constant 0 : i32
    return %c0_i32, %c0_i32_0 : i32, i32
  }
  func.func @transform_7(%arg0: i32) -> (i32, i32) {
    %c0_i32 = arith.constant 0 : i32
    %c0_i32_0 = arith.constant 0 : i32
    %c0_i32_1 = arith.constant 0 : i32
    return %c0_i32, %c0_i32_0 : i32, i32
  }
  func.func @transform_8(%arg0: i32) -> (i32, i32) {
    %c0_i32 = arith.constant 0 : i32
    %c0_i32_0 = arith.constant 0 : i32
    %c0_i32_1 = arith.constant 0 : i32
    return %c0_i32, %c0_i32_0 : i32, i32
  }
  func.func @transform_9(%arg0: i32) -> (i32, i32) {
    %c0_i32 = arith.constant 0 : i32
    %c0_i32_0 = arith.constant 0 : i32
    %c0_i32_1 = arith.constant 0 : i32
    return %c0_i32, %c0_i32_0 : i32, i32
  }
  func.func @transform_10(%arg0: i32) -> (i32, i32) {
    %c0_i32 = arith.constant 0 : i32
    %c0_i32_0 = arith.constant 0 : i32
    %c0_i32_1 = arith.constant 0 : i32
    return %c0_i32, %c0_i32_0 : i32, i32
  }
  func.func @transform_11(%arg0: i32) -> (i32, i32) {
    %c0_i32 = arith.constant 0 : i32
    %c0_i32_0 = arith.constant 0 : i32
    %c0_i32_1 = arith.constant 0 : i32
    return %c0_i32, %c0_i32_0 : i32, i32
  }
  func.func @transform_12(%arg0: i32) -> (i32, i32) {
    %c0_i32 = arith.constant 0 : i32
    %c0_i32_0 = arith.constant 0 : i32
    return %arg0, %c0_i32 : i32, i32
  }
}

</mosaic_0001>

<bundles_post_ra>
// kernel: tpu_custom_call.1
= control target key start
LH: loop header
LB: loop body
LE: loop exit
PB: predicated region body
PF: predicated region fallthrough
CT: control target
= control target key end

     0   :  { %s1536_s0 = inlined_call_operand.hbm [shape: f32[16,128], index: 0, kind: input, shape index: {}]   ;;  %s1537_s1 = inlined_call_operand.vmem [shape: s32[8,1], index: 1, kind: input, shape index: {}]   ;;  %s1538_s2 = inlined_call_operand.vmem [shape: f32[1,128], index: 2, kind: input, shape index: {}]   ;;  %s1539_s3 = inlined_call_operand.vmem [shape: f32[1,128], index: 3, kind: input, shape index: {}]   ;;  %s1540_s4 = inlined_call_operand.vmem [shape: f32[1,128], index: 4, kind: input, shape index: {}]   ;;  %s1541_s5 = inlined_call_operand.hbm [shape: bf16[128,384], index: 5, kind: input, shape index: {}]   ;;  %s1542_s6 = inlined_call_operand.vmem [shape: f32[1,384], index: 6, kind: input, shape index: {}]   ;;  %s1543_s7 = inlined_call_operand.vmem [shape: f32[1,128], index: 7, kind: input, shape index: {}]   ;;  %s1544_s8 = inlined_call_operand.vmem [shape: f32[1,128], index: 8, kind: input, shape index: {}]   ;;  %s1545_s9 = inlined_call_operand.vmem [shape: f32[1,128], index: 9, kind: input, shape index: {}]   ;;  %s1546_s10 = inlined_call_operand.vmem [shape: f32[1,128], index: 10, kind: input, shape index: {}]   ;;  %s1547_s11 = inlined_call_operand.vmem [shape: f32[1,128], index: 11, kind: input, shape index: {}]   ;;  %s1548_s12 = inlined_call_operand.hbm [shape: f32[16,128], index: 12, kind: output, shape index: {}]  }
   0x1   :  { %1554 = sst [smem:[#allocation16_spill]] %s1541_s5 }
   0x2   :  { %17 = vsyncpa [#allocation3], 0 }
   0x3   :  { %19 = vsyncpa [#allocation3 + $0x1], 0 }
   0x4   :  { %20 = vsyncpa [#allocation6], 0 }
   0x5   :  { %21 = vsyncpa [#allocation4], 0 }
   0x6   :  { %23 = vsyncpa [#allocation4 + $0x1], 0  ;;  %s1321_s21 = smov 0   ;;  %s1323_s22 = smov 0  }
   0x7   :  { %s1325_s23 = smov 0   ;;  %s1327_s24 = smov 0  }
   0x8 LB: > { %1555 = sst [smem:[#allocation11_spill]] %s1238_s21  ;;  %s1345_s28 = sadd.s32 4294967295, %s1250_s24   ;;  %s1250_s24 = sphi %s1327_s24, %s1569_s24   ;;  %s1246_s23 = sphi %s1325_s23, %s1571_s23   ;;  %s1242_s22 = sphi %s1323_s22, %s1573_s22   ;;  %s1238_s21 = sphi %s1321_s21, %s1572_s21  }
   0x9   : > { %1556 = sst [smem:[#allocation12_spill]] %s1246_s23  ;;  %p903_p0 = scmp.ge.s32.totalorder %s1250_s24, 1 }
   0xa   : > { %s1557_s5 = sld [smem:[#allocation16_spill]]  ;;  %p50_p1 = scmp.eq.s32.totalorder %s1345_s28, 0 }
   0xb   : > { %p317_p2 = scmp.lt.s32.totalorder %s1250_s24, 3  ;;  %s1252_s30 = smov [#allocation5]  }
   0xc   : > { %s342_s13 = sshll.u32 %s1252_s30, 4  ;;  %s1253_s14 = smov 192   ;;  %s343_s13 = int_to_ptr.vmem [resolvable:$true] %s342_s13 }
   0xd   : > { %p1350_p3 = pnand %p903_p0, %p317_p2  ;;  %s1254_s15 = smov 12  }
   0xe   : > { %s902_s16 = sadd.s32 4294967294, %s1250_s24   ;;  %s1361_s17 = sadd.s32 1, %s1250_s24  }
   0xf   : > { %p1044_p4 = pneg %p1350_p3  ;;  %1559 = sst [smem:[#allocation13_spill]] %s1361_s17 }
  0x10   : > { %s340_s27 = sshll.u32 %s1557_s5, 4  ;;  %s36_s18 = sadd.s32 1, %s1246_s23  ;;  %s341_s27 = int_to_ptr.hbm [resolvable:$true] %s340_s27 }
  0x11   : > { %p1045_p6 = pnand %p1044_p4, %p50_p1  ;;  %s33_s19 = ssub.s32 %s1250_s24, %s1361_s17 }
  0x12   : > { %p43_p7 = scmp.ne.s32.totalorder %s1246_s23, %s1242_s22  ;;  %p34_p8 = scmp.eq.s32.totalorder %s33_s19, 0 }
  0x13   : > { %1047 = dma.hbm_to_vmem [thread:$0]  (!%p1045_p6), %s341_s27, 3072, %s343_s13, [#allocation6], %s1253_s14, %s1253_s14, %s1254_s15  }
  0x14   : > { %p44_p9 = scmp.eq.s32.totalorder %s1250_s24, 0  ;;  %p49_p10 = scmp.ne.s32.totalorder %s1242_s22, %s1238_s21 }
  0x15   : > { %p304_p11 = scmp.eq.s32.totalorder %s1345_s28, 1  ;;  %p310_p0 = scmp.eq.s32.totalorder %s902_s16, 1 }
  0x16   : > { %s1373_s20 = scalar_select %p34_p8, %s1246_s23, %s36_s18  }
  0x17   : > { %p1377_p12 = por %p50_p1, %p49_p10  ;;  %p1381_p13 = por %p304_p11, %p43_p7 }
  0x18   : > { %1560 = sst [smem:[#allocation14_spill]] %s1373_s20  ;;  %p45_p2 = por %p44_p9, %p43_p7 }
  0x19   : > { %s374_s27 = sand.u32 1, %s1246_s23   ;;  %p1386_p4 = por %p310_p0, %p49_p10 }
  0x1a   : > { %p1057_p6 = scmp.lt.s32.totalorder %s1250_s24, 2  ;;  %s906_s13 = sshll.u32 %s374_s27, 3 }
  0x1b   : > { %s1563_s30 = scalar_select %p1386_p4, 1, 0 }
  0x1c   : > { %s907_s14 = sshll.u32 %s1250_s24, 3  ;;  %s378_s20 = scalar_lea.vmem [#allocation2], %s906_s13 }
  0x1d   : > { %1564 = sst [smem:[#allocation15_spill]] %s1563_s30  ;;  %s382_s19 = scalar_lea.hbm %s1536_s0, %s907_s14 }
  0x1e   : > { %s384_s5 = sshll.u32 %s382_s19, 4  ;;  %s386_s17 = sshll.u32 %s378_s20, 4  ;;  %s385_s5 = int_to_ptr.hbm [resolvable:$true] %s384_s5  ;;  %s387_s17 = int_to_ptr.vmem [resolvable:$true] %s386_s17 }
  0x1f   : > { %p1395_p8 = pnand %p1057_p6, %p45_p2  ;;  %s375_s23 = scalar_lea.sflag [#allocation3], %s374_s27 }
  0x20   : > { %s1150_s21 = sshra.s32 %s385_s5, 4  ;;  %s1157_s20 = scalar_lea.hbm %s1536_s0, 16  ;;  %s1151_s21 = int_to_ptr.hbm [resolvable:$true] %s1150_s21 }
  0x21   : > { %s1152_s30 = scalar_lea.hbm %s1151_s21, 8  ;;  %p1154_p9 = pneg %p1395_p8 }
  0x22   : > { %p1153_p7 = scmp.ne.s32.totalorder %s1151_s21, %s1152_s30  ;;  %p1158_p0 = scmp.lt.s32.totalorder %s1151_s21, %s1536_s0 }
  0x23   : > { %p1159_p2 = scmp.lt.s32.totalorder %s1157_s20, %s1152_s30 }
  0x24   : > { %p1155_p10 = pnand %p1154_p9, %p1153_p7 }
  0x25   : > { %p1160_p6 = por %p1159_p2, %p1158_p0 }
  0x26   : > { %p1156_p11 = pneg %p1155_p10 }
  0x28   : > { %p1161_p5 = pnand %p1160_p6, %p1156_p11 }
  0x2a   : > { %1164 = shalt.err (!%p1161_p5)
}
  0x2b   : > { %1051 = dma.hbm_to_vmem [thread:$0]  (!%p1395_p8), %s385_s5, 128, %s387_s17, %s375_s23  }
  0x2c   : > { %395 = sbr.rel (%p1350_p3) target bundleno = 517 (0x205), region = 68  ;;  %s1412_s27 = sand.u32 (!%p1350_p3), 1, %s1242_s22  }
  0x2d   : > { %s909_s19 = sshll.u32 (!%p1350_p3), %s1412_s27, 3  ;;  %s398_s14 = scalar_lea.sflag (!%p1350_p3), [#allocation3], %s1412_s27 }
  0x2e   : > { %s401_s21 = scalar_lea.vmem (!%p1350_p3), [#allocation2], %s909_s19 }
  0x31   : > { %1225 = dma.done.wait (%p1377_p12), %s398_s14, 128  }
  0x32   : > { %1227 = vsyncadd (%p1377_p12), %s398_s14, 4294967168 }
  0x33   : > { %1229 = dma.done.wait (%p50_p1), [#allocation6], 3072  }
  0x34   : > { %1231 = vsyncadd (%p50_p1), [#allocation6], 4294964224  ;;  %v1426_v0 = vld [vmem:[%s401_s21] sm:$0xff]  ;;  %v998_v2 = vld [vmem:[#allocation5 + $0xa8] sm:$0xf]  ;;  %v1255_v4 = vmov 0  }
  0x35   : > { %450 = vadd.xlane.f32.xlu0 %v1426_v0  ;;  %v1432_v1 = vld [vmem:[%s1537_s1] sm:$0xff]  ;;  %1096 = vset.pattern.permute.xlu1 %v1255_v4  ;;  %v1033_v6 = vld [vmem:[#allocation5 + $0xac] sm:$0xf]  ;;  %v1000_v7 = vld [vmem:[#allocation5 + $0xb4] sm:$0xf0]  ;;  %s1009_s15 = sshll.u32 %s1345_s28, 3 }
  0x36   : > { %v1034_v3 = vld [vmem:[#allocation5 + $0xb0] sm:$0xf0]  ;;  %vm702_vm0 = vcmp.ge.s32.totalorder %v1432_v1, 1  ;;  %1097 = vset.pattern.permute.xlu2 %v1255_v4  ;;  %v1003_v9 = vor.u32 %v1033_v6, %v1000_v7  ;;  %v1006_v10 = vld [vmem:[#allocation5 + $0xb0] sm:$0xf]  ;;  %1098 = vset.pattern.permute.xlu0 %v1255_v4  ;;  %vm710_vm1 = vcmp.lt.s32.totalorder %v1432_v1, 7  ;;  %s817_s18 = scalar_lea.hbm %s1548_s12, %s1009_s15 }
  0x37   : > { %v999_v5 = vor.u32 %v1034_v3, %v998_v2  ;;  %v704_v8 = vsel %vm702_vm0, 1, %v1255_v4  ;;  %v1035_v11 = vld [vmem:[#allocation5 + $0xb8] sm:$0xf0]  ;;  %v712_v13 = vsel %vm710_vm1, 1, %v1255_v4  ;;  %v1099_v16 = vld [vmem:[%s1538_s2] ss:$0 sm:$0xff] }
  0x38   : > { %706 = vperm.xlu1 %1096, %v704_v8   ;;  %v1007_v12 = vor.u32 %v1035_v11, %v1006_v10  ;;  %667 = vmatpush.bf16.msra.mxu1 %v1003_v9  ;;  %v986_v20 = vld [vmem:[#allocation5 + $0x90] sm:$0xf]  ;;  %v1031_v21 = vld [vmem:[#allocation5 + $0x98] sm:$0xf0]  ;;  %v1030_v22 = vld [vmem:[#allocation5 + $0x94] sm:$0xf] }
  0x39   : > { %654 = vmatpush.bf16.msra.mxu0 %v999_v5  ;;  %v987_v23 = vor.u32 %v1031_v21, %v986_v20  ;;  %v988_v24 = vld [vmem:[#allocation5 + $0x9c] sm:$0xf0]  ;;  %v994_v25 = vld [vmem:[#allocation5 + $0x98] sm:$0xf]  ;;  %v1032_v26 = vld [vmem:[#allocation5 + $0xa0] sm:$0xf0] }
  0x3a   : > { %680 = vmatpush.bf16.msra.mxu2 %v1007_v12  ;;  %v991_v27 = vor.u32 %v1030_v22, %v988_v24  ;;  %v995_v28 = vor.u32 %v1032_v26, %v994_v25  ;;  %v974_v29 = vld [vmem:[#allocation5 + $0x78] sm:$0xf]  ;;  %v1028_v30 = vld [vmem:[#allocation5 + $0x80] sm:$0xf0]  ;;  %v1027_v31 = vld [vmem:[#allocation5 + $0x7c] sm:$0xf] }
  0x3b   : > { %v975_v32 = vor.u32 %v1028_v30, %v974_v29  ;;  %v976_v33 = vld [vmem:[#allocation5 + $0x84] sm:$0xf0]  ;;  %v982_v34 = vld [vmem:[#allocation5 + $0x80] sm:$0xf]  ;;  %v1029_v35 = vld [vmem:[#allocation5 + $0x88] sm:$0xf0] }
  0x3c   : > { %668 = vmatpush.bf16.msra.mxu1 %v991_v27  ;;  %v979_v36 = vor.u32 %v1027_v31, %v976_v33  ;;  %v983_v37 = vor.u32 %v1029_v35, %v982_v34  ;;  %v962_v38 = vld [vmem:[#allocation5 + $0x60] sm:$0xf]  ;;  %v1025_v39 = vld [vmem:[#allocation5 + $0x68] sm:$0xf0]  ;;  %v1024_v40 = vld [vmem:[#allocation5 + $0x64] sm:$0xf] }
  0x3d   : > { %655 = vmatpush.bf16.msra.mxu0 %v987_v23  ;;  %v963_v41 = vor.u32 %v1025_v39, %v962_v38  ;;  %v964_v42 = vld [vmem:[#allocation5 + $0x6c] sm:$0xf0]  ;;  %v970_v43 = vld [vmem:[#allocation5 + $0x68] sm:$0xf]  ;;  %v1026_v44 = vld [vmem:[#allocation5 + $0x70] sm:$0xf0] }
  0x3e   : > { %681 = vmatpush.bf16.msra.mxu2 %v995_v28  ;;  %v967_v45 = vor.u32 %v1024_v40, %v964_v42  ;;  %v971_v46 = vor.u32 %v1026_v44, %v970_v43  ;;  %v950_v47 = vld [vmem:[#allocation5 + $0x48] sm:$0xf]  ;;  %v1022_v48 = vld [vmem:[#allocation5 + $0x50] sm:$0xf0]  ;;  %v1021_v49 = vld [vmem:[#allocation5 + $0x4c] sm:$0xf] }
  0x3f   : > { %v951_v50 = vor.u32 %v1022_v48, %v950_v47  ;;  %v952_v51 = vld [vmem:[#allocation5 + $0x54] sm:$0xf0]  ;;  %v958_v52 = vld [vmem:[#allocation5 + $0x50] sm:$0xf]  ;;  %v1023_v53 = vld [vmem:[#allocation5 + $0x58] sm:$0xf0] }
  0x40   : > { %714 = vperm.xlu1 %1096, %v712_v13   ;;  %669 = vmatpush.bf16.msra.mxu1 %v979_v36  ;;  %v955_v54 = vor.u32 %v1021_v49, %v952_v51  ;;  %v959_v55 = vor.u32 %v1023_v53, %v958_v52  ;;  %v938_v56 = vld [vmem:[#allocation5 + $0x30] sm:$0xf]  ;;  %v1019_v57 = vld [vmem:[#allocation5 + $0x38] sm:$0xf0]  ;;  %v1018_v58 = vld [vmem:[#allocation5 + $0x34] sm:$0xf] }
  0x41   : > { %656 = vmatpush.bf16.msra.mxu0 %v975_v32  ;;  %v939_v59 = vor.u32 %v1019_v57, %v938_v56  ;;  %v940_v60 = vld [vmem:[#allocation5 + $0x3c] sm:$0xf0]  ;;  %v946_v61 = vld [vmem:[#allocation5 + $0x38] sm:$0xf]  ;;  %v1020_v62 = vld [vmem:[#allocation5 + $0x40] sm:$0xf0] }
  0x42   : > { %682 = vmatpush.bf16.msra.mxu2 %v983_v37  ;;  %v943_v63 = vor.u32 %v1018_v58, %v940_v60  ;;  %v947_v2 = vor.u32 %v1020_v62, %v946_v61  ;;  %v926_v3 = vld [vmem:[#allocation5 + $0x18] sm:$0xf]  ;;  %v1016_v5 = vld [vmem:[#allocation5 + $0x20] sm:$0xf0]  ;;  %v1015_v6 = vld [vmem:[#allocation5 + $0x1c] sm:$0xf] }
  0x43   : > { %v927_v7 = vor.u32 %v1016_v5, %v926_v3  ;;  %v928_v8 = vld [vmem:[#allocation5 + $0x24] sm:$0xf0]  ;;  %v934_v9 = vld [vmem:[#allocation5 + $0x20] sm:$0xf]  ;;  %v1017_v10 = vld [vmem:[#allocation5 + $0x28] sm:$0xf0] }
  0x44   : > { %670 = vmatpush.bf16.msra.mxu1 %v967_v45  ;;  %v931_v11 = vor.u32 %v1015_v6, %v928_v8  ;;  %v935_v12 = vor.u32 %v1017_v10, %v934_v9  ;;  %v914_v13 = vld [vmem:[#allocation5] sm:$0xf]  ;;  %v1014_v20 = vld [vmem:[#allocation5 + $0x10] sm:$0xf0]  ;;  %v1100_v32 = vld [vmem:[%s1539_s3] ss:$0 sm:$0xff] }
  0x45   : > { %657 = vmatpush.bf16.msra.mxu0 %v963_v41  ;;  %vm780_vm5 = vcmp.ge.s32.totalorder %v1432_v1, 2  ;;  %v1101_v35 = vld [vmem:[%s1540_s4] ss:$0 sm:$0xff]  ;;  %vm793_vm6 = vcmp.ge.s32.totalorder %v1432_v1, 4  ;;  %s447_s14 = scalar_lea.vmem [#allocation7], %s909_s19  ;;  %s821_s5 = sshll.u32 %s817_s18, 4  ;;  %s822_s5 = int_to_ptr.hbm [resolvable:$true] %s821_s5 }
  0x46   : > { %683 = vmatpush.bf16.msra.mxu2 %v971_v46  ;;  %v782_v34 = vsel %vm780_vm5, 1, %v1255_v4  ;;  %v795_v40 = vsel %vm793_vm6, 1, %v1255_v4  ;;  %v1102_v1 = vld [vmem:[%s1543_s7] ss:$0 sm:$0xff]  ;;  %s819_s21 = sshll.u32 %s447_s14, 4  ;;  %s807_s28 = scalar_lea.sflag [#allocation4], %s1412_s27  ;;  %s820_s21 = int_to_ptr.vmem [resolvable:$true] %s819_s21 }
  0x47   : > { %784 = vperm.xlu2 %1097, %v782_v34   ;;  %v1103_v4 = vld [vmem:[%s1544_s8] ss:$0 sm:$0xff]  ;;  %s1194_s23 = sshra.s32 %s822_s5, 4  ;;  %s1200_s19 = scalar_lea.hbm %s1548_s12, 16  ;;  %s1195_s23 = int_to_ptr.hbm [resolvable:$true] %s1194_s23 }
  0x48   : > { %671 = vmatpush.bf16.msra.mxu1 %v955_v54  ;;  %v1104_v46 = vld [vmem:[%s1545_s9] ss:$0 sm:$0xff]  ;;  %s1196_s29 = scalar_lea.hbm %s1195_s23, 8  ;;  %p1201_p12 = scmp.lt.s32.totalorder %s1195_s23, %s1548_s12 }
  0x49   : > { %658 = vmatpush.bf16.msra.mxu0 %v951_v50  ;;  %v1105_v51 = vld [vmem:[%s1546_s10] ss:$0 sm:$0xff]  ;;  %p1197_p1 = scmp.ne.s32.totalorder %s1195_s23, %s1196_s29  ;;  %p1202_p8 = scmp.lt.s32.totalorder %s1200_s19, %s1196_s29 }
  0x4a   : > { %684 = vmatpush.bf16.msra.mxu2 %v959_v55  ;;  %v1487_v57 = vld [vmem:[%s1542_s6] sm:$0x7] }
  0x4b   : > { %p1198_p3 = pnand %p1197_p1, %p1381_p13  ;;  %p1203_p7 = por %p1202_p8, %p1201_p12 }
  0x4c   : > { %672 = vmatpush.bf16.msra.mxu1 %v943_v63 }
  0x4d   : > { %659 = vmatpush.bf16.msra.mxu0 %v939_v59  ;;  %v520_v59 = vperm.slane %v1487_v57, 0  ;;  %p1199_p5 = pneg %p1198_p3 }
  0x4e   : > { %685 = vmatpush.bf16.msra.mxu2 %v947_v2 }
  0x4f   : > { %797 = vperm.xlu2 %1097, %v795_v40   ;;  %p1204_p9 = pnand %p1203_p7, %p1199_p5 }
  0x50   : > { %673 = vmatpush.bf16.msra.mxu1 %v931_v11  ;;  %v759_v11 = vld [vmem:[%s1547_s11] sm:$0x1] }
  0x51   : > { %660 = vmatpush.bf16.msra.mxu0 %v927_v7 }
  0x52   : > { %686 = vmatpush.bf16.msra.mxu2 %v935_v12 }
  0xa8   : > { %v451_v14 = vpop.xlane.xlu0 %450 }
  0xa9   : > { %v452_v15 = vmul.f32 0.03125, %v451_v14  ;;  %v1013_v14 = vld [vmem:[#allocation5 + $0x8] sm:$0xf0] }
  0xaa   : > { %v1464_v41 = vpop.permute.xlu1 %706 }
  0xab   : > { %v453_v17 = vsub.f32 %v1426_v0, %v452_v15  ;;  %v1012_v15 = vld [vmem:[#allocation5 + $0x4] sm:$0xf]  ;;  %vm708_vm7 = vcmp.eq.s32.totalorder %v1464_v41, 1 }
  0xad   : > { %v1445_v18 = vmul.f32 %v1099_v16, %v453_v17  ;;  %v915_v16 = vor.u32 %v1013_v14, %v914_v13  ;;  %v916_v17 = vld [vmem:[#allocation5 + $0xc] sm:$0xf0] }
  0xae   : > { %v919_v21 = vor.u32 %v1012_v15, %v916_v17  ;;  %v760_v15 = vmul.f32 1.442695, %v759_v11 }
  0xaf   : > { %v459_v19 = vmul.f32 %v1445_v18, %v1445_v18  ;;  %661 = vmatpush.bf16.msra.mxu0 %v915_v16 }
  0xb0   : > { %674 = vmatpush.bf16.msra.mxu1 %v919_v21 }
  0xb1   : > { %460 = vadd.xlane.f32.xlu0 %v459_v19  ;;  %v922_v19 = vld [vmem:[#allocation5 + $0x8] sm:$0xf] }
  0xb2   : > { %v923_v22 = vor.u32 %v1014_v20, %v922_v19  ;;  %v715_v43 = vpop.permute.xlu1 %714  ;;  %v521_v20 = vperm.slane %v1487_v57, 1 }
  0xb3   : > { %vm716_vm8 = vcmp.eq.s32.totalorder %v715_v43, 1 }
  0xb4   : > { %687 = vmatpush.bf16.msra.mxu2 %v923_v22 }
 0x124   : > { %v461_v23 = vpop.xlane.xlu0 %460 }
 0x125   : > { %v462_v24 = vmul.f32 0.03125, %v461_v23 }
 0x127   : > { %v463_v25 = vadd.f32 1e-05, %v462_v24 }
 0x129   : > { %1106 = vrsqrt.f32 %v463_v25  ;;  %vm470_vm3 = vweird.f32 %v463_v25 }
 0x12f   : > { %v1107_v26 = vpop.eup %1106 }
 0x130   : > { %v465_v27 = vmul.f32 %v1107_v26, %v463_v25  ;;  %vm471_vm2 = vweird.f32 %v1107_v26 }
 0x131   : > { %vm472_vm4 = vmor %vm470_vm3, %vm471_vm2 }
 0x132   : > { %v466_v28 = vmul.f32 %v1107_v26, %v465_v27 }
 0x134   : > { %v467_v29 = vmul.f32 0.5, %v466_v28 }
 0x136   : > { %v468_v30 = vsub.f32 1.5, %v467_v29 }
 0x138   : > { %v469_v31 = vmul.f32 %v1107_v26, %v468_v30 }
 0x13a   : > { %v473_v33 = vsel %vm472_vm4, %v1107_v26, %v469_v31 }
 0x13b   : > { %v474_v36 = vmul.f32 %v473_v33, %v1445_v18 }
 0x13d   : > { %v479_v37 = vmul.f32 %v1100_v32, %v474_v36 }
 0x13f   : > { %v1459_v38 = vadd.f32 %v1101_v35, %v479_v37 }
 0x141   : > { %v485_v39 = vpack.c.bf16 %v1459_v38, %v1459_v38  ;;  %v703_v42 = vrot.slane %v1459_v38, 7  ;;  %v711_v44 = vrot.slane %v1459_v38, 1  ;;  %v727_v47 = vmul.f32 %v1103_v4, %v1459_v38 }
 0x143   : > { %662 = vmatmul.bf16.vlgmr.msra.gmra.mxu0 %v485_v39  ;;  %675 = vmatmul.bf16.vlgmr.msra.gmra.mxu1 %v485_v39  ;;  %v709_v18 = vsel %vm708_vm7, %v703_v42, 0.0  ;;  %v717_v48 = vsel %vm716_vm8, %v711_v44, 0.0  ;;  %v785_v42 = vpop.permute.xlu2 %784 }
 0x144   : > { %688 = vmatmul.bf16.vlgmr.msra.gmra.mxu2 %v485_v39  ;;  %v722_v45 = vmul.f32 %v1102_v1, %v709_v18  ;;  %v733_v50 = vmul.f32 %v1104_v46, %v717_v48  ;;  %vm786_vm13 = vcmp.eq.s32.totalorder %v785_v42, 1 }
 0x146   : > { %v728_v49 = vadd.f32 %v727_v47, %v722_v45 }
 0x148   : > { %v734_v52 = vadd.f32 %v733_v50, %v728_v49  ;;  %v522_v49 = vperm.slane %v1487_v57, 2 }
 0x14a   : > { %v739_v53 = vadd.f32 %v1105_v51, %v734_v52 }
 0x14b   : > { %v798_v52 = vpop.permute.xlu2 %797 }
 0x14c   : > { %v740_v54 = vsub.f32 0.0, %v739_v53  ;;  %vm799_vm14 = vcmp.eq.s32.totalorder %v798_v52, 1 }
 0x14e   : > { %v741_v55 = vmul.f32 1.442695, %v740_v54 }
 0x150   : > { %1108 = vpow2.f32 %v741_v55 }
 0x156   : > { %v1109_v56 = vpop.eup %1108 }
 0x157   : > { %v743_v58 = vadd.f32 1.0, %v1109_v56 }
 0x159   : > { %1110 = vrcp.f32 %v743_v58  ;;  %v755_v19 = vand.u32 2147483648, %v743_v58  ;;  %vm749_vm10 = vweird.f32 %v743_v58  ;;  %v753_v21 = vand.u32 2147483647, %v743_v58 }
 0x15b   : > { %v756_v27 = vor.u32 1.1754944e-38, %v755_v19  ;;  %vm754_vm12 = vcmp.eq.f32.partialorder %v753_v21, 8.507059e+37 }
 0x15f   : > { %v1111_v3 = vpop.eup %1110 }
 0x160   : > { %v745_v9 = vmul.f32 %v1111_v3, %v743_v58  ;;  %vm750_vm9 = vweird.f32 %v1111_v3 }
 0x161   : > { %vm751_vm11 = vmor %vm749_vm10, %vm750_vm9 }
 0x162   : > { %v746_v10 = vsub.f32 1.0, %v745_v9 }
 0x164   : > { %v747_v16 = vmul.f32 %v1111_v3, %v746_v10 }
 0x166   : > { %v748_v17 = vadd.f32 %v1111_v3, %v747_v16 }
 0x168   : > { %v752_v25 = vsel %vm751_vm11, %v1111_v3, %v748_v17 }
 0x169   : > { %v757_v30 = vsel %vm754_vm12, %v756_v27, %v752_v25 }
 0x1c0   : > { %v663_v60 = vpop.f32.mrf.mxu0  ;;  %v676_v61 = vpop.f32.mrf.mxu1 }
 0x1c1   : > { %v664_v62 = vadd.f32 %v663_v60, %v520_v59  ;;  %v677_v29 = vadd.f32 %v676_v61, %v521_v20 }
 0x1c3   : > { %v694_v63 = vand.u32 2147483647, %v664_v62  ;;  %v693_v23 = vmax.f32 %v664_v62, 0.0  ;;  %v770_v34 = vmul.f32 %v757_v30, %v677_v29 }
 0x1c5   : > { %v695_v2 = vsub.f32 0.0, %v694_v63  ;;  %v771_v37 = vmul.f32 %v770_v34, %v1459_v38 }
 0x1c7   : > { %v696_v5 = vmul.f32 1.442695, %v695_v2  ;;  %v689_v6 = vpop.f32.mrf.mxu2  ;;  %v773_v39 = vrot.slane %v771_v37, 7 }
 0x1c8   : > { %v665_v7 = vpop.f32.mrf.mxu0  ;;  %v678_v8 = vpop.f32.mrf.mxu1  ;;  %v690_v54 = vadd.f32 %v689_v6, %v522_v49 }
 0x1c9   : > { %1112 = vpow2.f32 %v696_v5  ;;  %v774_v1 = vsel %vm708_vm7, %v773_v39, 0.0 }
 0x1ca   : > { %v772_v58 = vmul.f32 %v757_v30, %v690_v54 }
 0x1cf   : > { %v1113_v12 = vpop.eup %1112  ;;  %v691_v13 = vpop.f32.mrf.mxu2 }
 0x1d0   : > { %v698_v14 = vadd.f32 1.0, %v1113_v12 }
 0x1d2   : > { %1114 = vlog2.f32 %v698_v14 }
 0x1d3   : > { %1116 = vpow2.f32 %v760_v15 }
 0x1d8   : > { %v1115_v22 = vpop.eup %1114 }
 0x1d9   : > { %v700_v24 = vmul.f32 0.6931472, %v1115_v22  ;;  %v1117_v26 = vpop.eup %1116 }
 0x1da   : > { %v765_v32 = vperm.slane %v1117_v26, 0 }
 0x1db   : > { %v701_v28 = vadd.f32 %v700_v24, %v693_v23 }
 0x1dd   : > { %v762_v31 = vmul.f32 %v757_v30, %v701_v28 }
 0x1df   : > { %v763_v33 = vsub.f32 0.0, %v762_v31 }
 0x1e1   : > { %v767_v35 = vmul.f32 %v765_v32, %v763_v33 }
 0x1e3   : > { %v768_v36 = vmul.f32 1.442695, %v767_v35 }
 0x1e5   : > { %1118 = vpow2.f32 %v768_v36 }
 0x1eb   : > { %v1119_v40 = vpop.eup %1118 }
 0x1ec   : > { %v775_v18 = vmul.f32 %v1119_v40, %v774_v1  ;;  %v777_v43 = vrot.slane %v1119_v40, 7 }
 0x1ee   : > { %v776_v4 = vadd.f32 %v775_v18, %v771_v37  ;;  %v778_v44 = vsel %vm708_vm7, %v777_v43, 1.0 }
 0x1ef   : > { %v779_v45 = vmul.f32 %v1119_v40, %v778_v44 }
 0x1f0   : > { %v781_v46 = vrot.slane %v776_v4, 6 }
 0x1f1   : > { %v790_v47 = vrot.slane %v779_v45, 6 }
 0x1f2   : > { %v787_v48 = vsel %vm786_vm13, %v781_v46, 0.0 }
 0x1f3   : > { %v788_v38 = vmul.f32 %v787_v48, %v779_v45  ;;  %v791_v51 = vsel %vm786_vm13, %v790_v47, 1.0 }
 0x1f4   : > { %v792_v55 = vmul.f32 %v791_v51, %v779_v45 }
 0x1f5   : > { %v789_v50 = vadd.f32 %v788_v38, %v776_v4 }
 0x1f7   : > { %v794_v53 = vrot.slane %v789_v50, 4 }
 0x1f9   : > { %v800_v41 = vsel %vm799_vm14, %v794_v53, 0.0 }
 0x1fa   : > { %v801_v56 = vmul.f32 %v800_v41, %v792_v55 }
 0x1fc   : > { %v802_v59 = vadd.f32 %v801_v56, %v789_v50 }
 0x1fe   : > { %v803_v57 = vmul.f32 %v802_v59, %v772_v58 }
 0x200   : > { %v804_v60 = vadd.f32 %v803_v57, %v1426_v0 }
 0x202   : > { %805 = vst [vmem:[%s447_s14] sm:$0xff] %v804_v60 }
 0x203   : > { %1207 = shalt.err (!%p1204_p9)
}
 0x204   : > { %1042 = dma.vmem_to_hbm [thread:$0]  (%p1381_p13), %s820_s21, 128, %s822_s5, %s807_s28  }
 0x205 PF: > { %s1566_s27 = sld [smem:[#allocation11_spill]]  ;;  %p1568_p10 = scmp.ge.s32.totalorder %s1250_s24, 2 }
 0x207   : > { %p1053_p11 = pnand %p1568_p10, %p1386_p4 }
 0x209   : > { %p1054_p0 = pneg %p1053_p11 }
 0x20b   : > { %s833_s20 = sand.u32 1, %s1566_s27  }
 0x20c   : > { %s834_s13 = scalar_lea.sflag [#allocation4], %s833_s20 }
 0x20d   : > { %1233 = dma.done.wait (%p1054_p0), %s834_s13, 128  }
 0x20e   : > { %1235 = vsyncadd (%p1054_p0), %s834_s13, 4294967168  ;;  %s1569_s24 = sld [smem:[#allocation13_spill]]  ;;  %s1572_s21 = smov %s1242_s22 }
 0x20f   : > { %s1570_s18 = sld [smem:[#allocation12_spill]] }
 0x210   : > { %s1571_s23 = sld [smem:[#allocation14_spill]] }
 0x214   : > { %p26_p2 = scmp.ge.s32.totalorder %s1569_s24, 4  }
 0x215   : > { %s1573_s22 = smov %s1570_s18 }
 0x216   :  { %28 = sbr.rel (!%p26_p2) target bundleno = 8 (0x8), region = 117 }
 0x21b   :  { %840 = vsyncpa [#allocation3], 1 }
 0x21c   :  { %842 = vsyncpa [#allocation3 + $0x1], 1 }
 0x21d   :  { %843 = vsyncpa [#allocation6], 1 }
 0x21e   :  { %844 = vsyncpa [#allocation4], 1 }
 0x21f   :  { %846 = vsyncpa [#allocation4 + $0x1], 1 }

</bundles_post_ra>
